<compile_context>
chip_gen: v6e
topology: v6e:2x2x1
jax: 0.10.0
libtpu: 0.0.40
codegen_flags: <defaults>
</compile_context>

<pallas_src>
import jax
import jax.numpy as jnp
from jax import lax
from jax.experimental import pallas as pl
from jax.experimental.pallas import tpu as pltpu  # noqa: F401  (TPU backend)

_LANE = 128
_SUBLANE = 8


def _round_up(n, m):
    return ((n + m - 1) // m) * m


def _linear_kernel(x_ref, w_ref, b_ref, o_ref):
    # x: (B_pad, D), w: (O_pad, D) in PyTorch layout, b: (1, O_pad).
    # Contract on dim 1 of both operands (x @ w.T) so the MXU consumes the
    # (O, D) layout directly; accumulate in f32.
    acc = lax.dot_general(
        x_ref[...], w_ref[...],
        dimension_numbers=(((1,), (1,)), ((), ())),
        preferred_element_type=jnp.float32,
    )
    o_ref[...] = (acc + b_ref[...]).astype(o_ref.dtype)


def prepare_params(weight, bias):
    """One-time (outside the hot path) padding of the classifier params.

    weight: (O, D) PyTorch layout, bias: (O,).  Returns (w_pad, b_pad) with the
    output dim padded to a multiple of 128 so the kernel output is lane-dense.
    """
    O, D = weight.shape
    O_pad = max(_LANE, _round_up(O, _LANE))
    w_pad = jnp.zeros((O_pad, D), weight.dtype).at[:O, :].set(weight)
    b_pad = jnp.zeros((1, O_pad), bias.dtype).at[0, :O].set(bias)
    return w_pad, b_pad


def linear_classifier_padded(x, w_pad, b_pad, output_dim):
    """Hot path: x (B, D) f32, w_pad (O_pad, D), b_pad (1, O_pad)."""
    B, D = x.shape
    O_pad = w_pad.shape[0]

    # Keep the sublane dim dense; no-op when B is already a multiple of 8.
    B_pad = max(_SUBLANE, _round_up(B, _SUBLANE))
    if B_pad != B:
        x_in = jnp.zeros((B_pad, D), x.dtype).at[:B, :].set(x)
    else:
        x_in = x

    out_padded = pl.pallas_call(
        _linear_kernel,
        out_shape=jax.ShapeDtypeStruct((B_pad, O_pad), x.dtype),
        # No grid / no BlockSpecs: whole arrays land in VMEM; no 1-step
        # pipeline bookkeeping for this tiny, latency-bound problem.
        cost_estimate=pl.CostEstimate(
            flops=2 * B_pad * D * O_pad,
            transcendentals=0,
            bytes_accessed=4 * (B_pad * D + O_pad * D + O_pad + B_pad * O_pad),
        ),
    )(x_in, w_pad, b_pad)

    return out_padded[:B, :output_dim]


def linear_classifier(x, weight, bias):
    """Convenience wrapper matching LinearClassifier.forward semantics.

    x: (B, D) f32; weight: (O, D) (PyTorch nn.Linear layout); bias: (O,).
    """
    w_pad, b_pad = prepare_params(weight, bias)
    return linear_classifier_padded(x, w_pad, b_pad, weight.shape[0])


if __name__ == "__main__":
    INPUT_DIM = 768
    OUTPUT_DIM = 2
    BATCH = 8

    key = jax.random.PRNGKey(0)
    kx, kw, kb = jax.random.split(key, 3)

    # Deterministic parameter init matching torch.nn.Linear's default
    # (uniform in +/- 1/sqrt(input_dim)).
    bound = 1.0 / (INPUT_DIM ** 0.5)
    weight = jax.random.uniform(kw, (OUTPUT_DIM, INPUT_DIM),
                                minval=-bound, maxval=bound,
                                dtype=jnp.float32)
    bias = jax.random.uniform(kb, (OUTPUT_DIM,),
                              minval=-bound, maxval=bound,
                              dtype=jnp.float32)

    x = jax.random.normal(kx, (BATCH, INPUT_DIM), dtype=jnp.float32)

    out = linear_classifier(x, weight, bias)
    out = jax.block_until_ready(out)

    # Reference check against plain JAX linear.
    ref = x @ weight.T + bias
    assert out.shape == (BATCH, OUTPUT_DIM)
    assert jnp.allclose(out, ref, atol=1e-5, rtol=1e-5)

    print("KERNEL_OK")
</pallas_src>

<mosaic_0001>
module attributes {stable_mosaic.version = 11 : i64} {
  func.func @_linear_kernel(%arg0: memref<8x768xf32, #tpu.memory_space<vmem>>, %arg1: memref<128x768xf32, #tpu.memory_space<vmem>>, %arg2: memref<1x128xf32, #tpu.memory_space<vmem>>, %arg3: memref<8x128xf32, #tpu.memory_space<vmem>>) attributes {dimension_semantics = [], scalar_prefetch = 0 : i64, scratch_operands = 0 : i64, tpu.core_type = #tpu.core_type<tc>} {
    %c0 = arith.constant 0 : index
    %c0_0 = arith.constant 0 : index
    %0 = vector.load %arg0[%c0, %c0_0] : memref<8x768xf32, #tpu.memory_space<vmem>>, vector<8x768xf32>
    %c0_1 = arith.constant 0 : index
    %c0_2 = arith.constant 0 : index
    %1 = vector.load %arg1[%c0_1, %c0_2] : memref<128x768xf32, #tpu.memory_space<vmem>>, vector<128x768xf32>
    %cst = arith.constant dense<0.000000e+00> : vector<8x128xf32>
    %2 = tpu.matmul %0, %1, %cst {dimension_numbers = #tpu.dot_dimension_numbers<[1], [1], [0], [0], [0, 0, 1, 0], [], []>} : vector<8x768xf32>, vector<128x768xf32>, vector<8x128xf32> -> vector<8x128xf32>
    %c0_3 = arith.constant 0 : index
    %c0_4 = arith.constant 0 : index
    %3 = vector.load %arg2[%c0_3, %c0_4] : memref<1x128xf32, #tpu.memory_space<vmem>>, vector<1x128xf32>
    %4 = vector.broadcast %3 : vector<1x128xf32> to vector<8x128xf32>
    %5 = arith.addf %2, %4 : vector<8x128xf32>
    %c0_5 = arith.constant 0 : index
    %c0_6 = arith.constant 0 : index
    %6 = vector.load %arg3[%c0_5, %c0_6] : memref<8x128xf32, #tpu.memory_space<vmem>>, vector<8x128xf32>
    tpu.vector_store %arg3[%c0_5, %c0_6], %5 {strides = array<i32>} : memref<8x128xf32, #tpu.memory_space<vmem>>, vector<8x128xf32>,
    return
  }
}

</mosaic_0001>

<bundles_post_ra>
// kernel: tpu_custom_call.1
= control target key start
LH: loop header
LB: loop body
LE: loop exit
PB: predicated region body
PF: predicated region fallthrough
CT: control target
= control target key end

     0   :  { %8 = vsyncpa [#allocation3], 0  ;;  %s486_s0 = inlined_call_operand.hbm [shape: f32[8,768], index: 0, kind: input, shape index: {}]   ;;  %s487_s1 = inlined_call_operand.hbm [shape: f32[128,768], index: 1, kind: input, shape index: {}]   ;;  %s488_s2 = inlined_call_operand.vmem [shape: f32[1,128], index: 2, kind: input, shape index: {}]   ;;  %s489_s3 = inlined_call_operand.hbm [shape: f32[8,128], index: 3, kind: output, shape index: {}]  }
   0x1   :  { %9 = vsyncpa [#allocation6], 0 }
   0x2   :  { %10 = vsyncpa [#allocation4], 0  ;;  %s449_s12 = smov [#allocation2]   ;;  %s450_s14 = smov [#allocation5]  }
   0x3   :  { %s17_s13 = sshll.u32 %s449_s12, 4  ;;  %s26_s15 = sshll.u32 %s450_s14, 4  ;;  %s18_s13 = int_to_ptr.vmem [resolvable:$true] %s17_s13  ;;  %s27_s15 = int_to_ptr.vmem [resolvable:$true] %s26_s15 }
   0x4   :  { %s391_s16 = scalar_lea.vmem %s18_s13, 768  ;;  %p396_p1 = scmp.lt.s32.totalorder %s18_s13, %s18_s13 }
   0x5   :  { %p392_p0 = scmp.ne.s32.totalorder %s18_s13, %s391_s16  ;;  %p397_p2 = scmp.lt.s32.totalorder %s391_s16, %s391_s16 }
   0x7   :  { %p398_p3 = por %p397_p2, %p396_p1 }
   0x9   :  { %p399_p4 = pnand %p398_p3, %p392_p0 }
   0xb   :  { %402 = shalt.err (!%p399_p4)
}
   0xc   :  { %20 = dma.hbm_to_vmem [thread:$0]  %s486_s0, 768, %s18_s13, [#allocation3]  }
   0xd   :  { %s411_s19 = scalar_lea.vmem %s27_s15, 12288  ;;  %p416_p6 = scmp.lt.s32.totalorder %s27_s15, %s27_s15 }
   0xe   :  { %p412_p5 = scmp.ne.s32.totalorder %s27_s15, %s411_s19  ;;  %p417_p7 = scmp.lt.s32.totalorder %s411_s19, %s411_s19 }
  0x10   :  { %p418_p8 = por %p417_p7, %p416_p6 }
  0x12   :  { %p419_p9 = pnand %p418_p8, %p412_p5 }
  0x14   :  { %422 = shalt.err (!%p419_p9)
}
  0x15   :  { %s451_s20 = smov 768   ;;  %s452_s21 = smov 48  }
  0x16   :  { %32 = dma.hbm_to_vmem [thread:$0]  %s487_s1, 12288, %s27_s15, [#allocation6], %s451_s20, %s451_s20, %s452_s21  }
  0x17   :  { %443 = dma.done.wait [#allocation3], 768  }
  0x18   :  { %444 = vsyncadd [#allocation3], 4294966528 }
  0x19   :  { %445 = dma.done.wait [#allocation6], 12288  }
  0x1a   :  { %446 = vsyncadd [#allocation6], 4294955008  ;;  %v138_v0 = vld [vmem:[#allocation5 + $0x2d8] sm:$0xff]  ;;  %v137_v1 = vld [vmem:[#allocation5 + $0x2d0] sm:$0xff]  ;;  %s453_s24 = smov [#allocation7]  }
  0x1b   :  { %v140_v2 = vld [vmem:[#allocation5 + $0x2e8] sm:$0xff]  ;;  %150 = vmatprep.subr.mxu0 %v138_v0  ;;  %v139_v4 = vld [vmem:[#allocation5 + $0x2e0] sm:$0xff]  ;;  %v134_v5 = vld [vmem:[#allocation5 + $0x2b8] sm:$0xff]  ;;  %s367_s25 = sshll.u32 %s453_s24, 4  ;;  %s368_s25 = int_to_ptr.vmem [resolvable:$true] %s367_s25 }
  0x1c   :  { %220 = vmatprep.subr.mxu1 %v140_v2  ;;  %v132_v3 = vld [vmem:[#allocation5 + $0x2a8] sm:$0xff]  ;;  %151 = vmatpush1.xpose.msra.mxu0 %v137_v1  ;;  %v131_v6 = vld [vmem:[#allocation5 + $0x2a0] sm:$0xff]  ;;  %v133_v7 = vld [vmem:[#allocation5 + $0x2b0] sm:$0xff]  ;;  %s423_s26 = scalar_lea.vmem %s368_s25, 128  ;;  %p428_p11 = scmp.lt.s32.totalorder %s368_s25, %s368_s25 }
  0x1d   :  { %221 = vmatpush1.xpose.msra.mxu1 %v139_v4  ;;  %152 = vmatprep.subr.mxu0 %v132_v3  ;;  %v126_v8 = vld [vmem:[#allocation5 + $0x278] sm:$0xff]  ;;  %v128_v9 = vld [vmem:[#allocation5 + $0x288] sm:$0xff]  ;;  %v125_v10 = vld [vmem:[#allocation5 + $0x270] sm:$0xff]  ;;  %p424_p10 = scmp.ne.s32.totalorder %s368_s25, %s423_s26  ;;  %p429_p12 = scmp.lt.s32.totalorder %s423_s26, %s423_s26 }
  0x1e   :  { %222 = vmatprep.subr.mxu1 %v134_v5  ;;  %v127_v11 = vld [vmem:[#allocation5 + $0x280] sm:$0xff]  ;;  %v120_v12 = vld [vmem:[#allocation5 + $0x248] sm:$0xff]  ;;  %v122_v13 = vld [vmem:[#allocation5 + $0x258] sm:$0xff] }
  0x1f   :  { %v119_v14 = vld [vmem:[#allocation5 + $0x240] sm:$0xff]  ;;  %v121_v15 = vld [vmem:[#allocation5 + $0x250] sm:$0xff]  ;;  %v114_v16 = vld [vmem:[#allocation5 + $0x218] sm:$0xff]  ;;  %p430_p13 = por %p429_p12, %p428_p11 }
  0x20   :  { %153 = vmatpush1.xpose.msra.mxu0 %v131_v6  ;;  %v116_v17 = vld [vmem:[#allocation5 + $0x228] sm:$0xff]  ;;  %v113_v18 = vld [vmem:[#allocation5 + $0x210] sm:$0xff]  ;;  %v115_v19 = vld [vmem:[#allocation5 + $0x220] sm:$0xff] }
  0x21   :  { %223 = vmatpush1.xpose.msra.mxu1 %v133_v7  ;;  %154 = vmatprep.subr.mxu0 %v126_v8  ;;  %v108_v20 = vld [vmem:[#allocation5 + $0x1e8] sm:$0xff]  ;;  %v110_v21 = vld [vmem:[#allocation5 + $0x1f8] sm:$0xff]  ;;  %v107_v22 = vld [vmem:[#allocation5 + $0x1e0] sm:$0xff]  ;;  %p431_p0 = pnand %p430_p13, %p424_p10 }
  0x22   :  { %224 = vmatprep.subr.mxu1 %v128_v9  ;;  %v109_v23 = vld [vmem:[#allocation5 + $0x1f0] sm:$0xff]  ;;  %v102_v24 = vld [vmem:[#allocation5 + $0x1b8] sm:$0xff]  ;;  %v104_v25 = vld [vmem:[#allocation5 + $0x1c8] sm:$0xff] }
  0x23   :  { %v42_v26 = vld [vmem:[#allocation2 + $0x8] sm:$0xff]  ;;  %v44_v27 = vld [vmem:[#allocation2 + $0x18] sm:$0xff]  ;;  %v101_v28 = vld [vmem:[#allocation5 + $0x1b0] sm:$0xff] }
  0x24   :  { %155 = vmatpush1.xpose.msra.mxu0 %v125_v10  ;;  %214 = vmatprep.mubr.f32.mxu0 %v42_v26  ;;  %v103_v29 = vld [vmem:[#allocation5 + $0x1c0] sm:$0xff]  ;;  %v96_v30 = vld [vmem:[#allocation5 + $0x188] sm:$0xff]  ;;  %v98_v31 = vld [vmem:[#allocation5 + $0x198] sm:$0xff] }
  0x25   :  { %225 = vmatpush1.xpose.msra.mxu1 %v127_v11  ;;  %156 = vmatprep.subr.mxu0 %v120_v12  ;;  %v95_v32 = vld [vmem:[#allocation5 + $0x180] sm:$0xff]  ;;  %v97_v33 = vld [vmem:[#allocation5 + $0x190] sm:$0xff]  ;;  %v90_v34 = vld [vmem:[#allocation5 + $0x158] sm:$0xff] }
  0x26   :  { %226 = vmatprep.subr.mxu1 %v122_v13  ;;  %284 = vmatprep.mubr.f32.mxu1 %v44_v27  ;;  %v92_v35 = vld [vmem:[#allocation5 + $0x168] sm:$0xff]  ;;  %v89_v36 = vld [vmem:[#allocation5 + $0x150] sm:$0xff]  ;;  %v91_v37 = vld [vmem:[#allocation5 + $0x160] sm:$0xff] }
  0x27   :  { %v84_v38 = vld [vmem:[#allocation5 + $0x128] sm:$0xff]  ;;  %v86_v39 = vld [vmem:[#allocation5 + $0x138] sm:$0xff]  ;;  %v83_v40 = vld [vmem:[#allocation5 + $0x120] sm:$0xff] }
  0x28   :  { %157 = vmatpush1.xpose.msra.mxu0 %v119_v14  ;;  %v85_v41 = vld [vmem:[#allocation5 + $0x130] sm:$0xff]  ;;  %v78_v42 = vld [vmem:[#allocation5 + $0xf8] sm:$0xff]  ;;  %v80_v43 = vld [vmem:[#allocation5 + $0x108] sm:$0xff] }
  0x29   :  { %227 = vmatpush1.xpose.msra.mxu1 %v121_v15  ;;  %158 = vmatprep.subr.mxu0 %v114_v16  ;;  %v77_v44 = vld [vmem:[#allocation5 + $0xf0] sm:$0xff]  ;;  %v79_v45 = vld [vmem:[#allocation5 + $0x100] sm:$0xff]  ;;  %v72_v46 = vld [vmem:[#allocation5 + $0xc8] sm:$0xff] }
  0x2a   :  { %228 = vmatprep.subr.mxu1 %v116_v17  ;;  %v74_v47 = vld [vmem:[#allocation5 + $0xd8] sm:$0xff]  ;;  %v71_v48 = vld [vmem:[#allocation5 + $0xc0] sm:$0xff]  ;;  %v73_v49 = vld [vmem:[#allocation5 + $0xd0] sm:$0xff] }
  0x2b   :  { %v66_v50 = vld [vmem:[#allocation5 + $0x98] sm:$0xff]  ;;  %v68_v51 = vld [vmem:[#allocation5 + $0xa8] sm:$0xff]  ;;  %v65_v52 = vld [vmem:[#allocation5 + $0x90] sm:$0xff] }
  0x2c   :  { %159 = vmatpush1.xpose.msra.mxu0 %v113_v18  ;;  %v67_v53 = vld [vmem:[#allocation5 + $0xa0] sm:$0xff]  ;;  %v60_v54 = vld [vmem:[#allocation5 + $0x68] sm:$0xff]  ;;  %v62_v55 = vld [vmem:[#allocation5 + $0x78] sm:$0xff] }
  0x2d   :  { %229 = vmatpush1.xpose.msra.mxu1 %v115_v19  ;;  %160 = vmatprep.subr.mxu0 %v108_v20  ;;  %v59_v56 = vld [vmem:[#allocation5 + $0x60] sm:$0xff]  ;;  %v61_v57 = vld [vmem:[#allocation5 + $0x70] sm:$0xff]  ;;  %v54_v58 = vld [vmem:[#allocation5 + $0x38] sm:$0xff] }
  0x2e   :  { %230 = vmatprep.subr.mxu1 %v110_v21  ;;  %v56_v59 = vld [vmem:[#allocation5 + $0x48] sm:$0xff]  ;;  %v53_v60 = vld [vmem:[#allocation5 + $0x30] sm:$0xff]  ;;  %v55_v61 = vld [vmem:[#allocation5 + $0x40] sm:$0xff] }
  0x2f   :  { %v48_v62 = vld [vmem:[#allocation5 + $0x8] sm:$0xff]  ;;  %v50_v63 = vld [vmem:[#allocation5 + $0x18] sm:$0xff]  ;;  %v47_v0 = vld [vmem:[#allocation5] sm:$0xff] }
  0x30   :  { %161 = vmatpush1.xpose.msra.mxu0 %v107_v22  ;;  %v49_v1 = vld [vmem:[#allocation5 + $0x10] sm:$0xff]  ;;  %v142_v2 = vld [vmem:[#allocation5 + $0x2f8] sm:$0xff]  ;;  %v43_v4 = vld [vmem:[#allocation2 + $0x10] sm:$0xff] }
  0x31   :  { %231 = vmatpush1.xpose.msra.mxu1 %v109_v23  ;;  %162 = vmatprep.subr.mxu0 %v102_v24  ;;  %v41_v3 = vld [vmem:[#allocation2] sm:$0xff]  ;;  %v46_v6 = vld [vmem:[#allocation2 + $0x28] sm:$0xff]  ;;  %v136_v7 = vld [vmem:[#allocation5 + $0x2c8] sm:$0xff] }
  0x32   :  { %232 = vmatprep.subr.mxu1 %v104_v25  ;;  %v141_v5 = vld [vmem:[#allocation5 + $0x2f0] sm:$0xff]  ;;  %v135_v8 = vld [vmem:[#allocation5 + $0x2c0] sm:$0xff]  ;;  %v130_v9 = vld [vmem:[#allocation5 + $0x298] sm:$0xff] }
  0x33   :  { %v129_v10 = vld [vmem:[#allocation5 + $0x290] sm:$0xff]  ;;  %v124_v11 = vld [vmem:[#allocation5 + $0x268] sm:$0xff]  ;;  %v123_v12 = vld [vmem:[#allocation5 + $0x260] sm:$0xff] }
  0x34   :  { %163 = vmatpush1.xpose.msra.mxu0 %v101_v28  ;;  %v118_v13 = vld [vmem:[#allocation5 + $0x238] sm:$0xff]  ;;  %v117_v14 = vld [vmem:[#allocation5 + $0x230] sm:$0xff]  ;;  %v112_v15 = vld [vmem:[#allocation5 + $0x208] sm:$0xff] }
  0x35   :  { %233 = vmatpush1.xpose.msra.mxu1 %v103_v29  ;;  %164 = vmatprep.subr.mxu0 %v96_v30  ;;  %v111_v16 = vld [vmem:[#allocation5 + $0x200] sm:$0xff]  ;;  %v106_v17 = vld [vmem:[#allocation5 + $0x1d8] sm:$0xff]  ;;  %v105_v18 = vld [vmem:[#allocation5 + $0x1d0] sm:$0xff] }
  0x36   :  { %234 = vmatprep.subr.mxu1 %v98_v31  ;;  %v100_v19 = vld [vmem:[#allocation5 + $0x1a8] sm:$0xff]  ;;  %v99_v20 = vld [vmem:[#allocation5 + $0x1a0] sm:$0xff]  ;;  %v94_v21 = vld [vmem:[#allocation5 + $0x178] sm:$0xff] }
  0x37   :  { %v93_v22 = vld [vmem:[#allocation5 + $0x170] sm:$0xff]  ;;  %v88_v23 = vld [vmem:[#allocation5 + $0x148] sm:$0xff]  ;;  %v87_v24 = vld [vmem:[#allocation5 + $0x140] sm:$0xff] }
  0x38   :  { %165 = vmatpush1.xpose.msra.mxu0 %v95_v32  ;;  %v82_v25 = vld [vmem:[#allocation5 + $0x118] sm:$0xff]  ;;  %v81_v26 = vld [vmem:[#allocation5 + $0x110] sm:$0xff]  ;;  %v76_v27 = vld [vmem:[#allocation5 + $0xe8] sm:$0xff] }
  0x39   :  { %235 = vmatpush1.xpose.msra.mxu1 %v97_v33  ;;  %166 = vmatprep.subr.mxu0 %v90_v34  ;;  %v75_v28 = vld [vmem:[#allocation5 + $0xe0] sm:$0xff]  ;;  %v70_v29 = vld [vmem:[#allocation5 + $0xb8] sm:$0xff]  ;;  %v69_v30 = vld [vmem:[#allocation5 + $0xb0] sm:$0xff] }
  0x3a   :  { %236 = vmatprep.subr.mxu1 %v92_v35  ;;  %v64_v31 = vld [vmem:[#allocation5 + $0x88] sm:$0xff]  ;;  %v63_v32 = vld [vmem:[#allocation5 + $0x80] sm:$0xff]  ;;  %v58_v33 = vld [vmem:[#allocation5 + $0x58] sm:$0xff] }
  0x3b   :  { %v57_v34 = vld [vmem:[#allocation5 + $0x50] sm:$0xff]  ;;  %v52_v35 = vld [vmem:[#allocation5 + $0x28] sm:$0xff] }
  0x3c   :  { %167 = vmatpush1.xpose.msra.mxu0 %v89_v36  ;;  %v51_v36 = vld [vmem:[#allocation5 + $0x20] sm:$0xff] }
  0x3d   :  { %237 = vmatpush1.xpose.msra.mxu1 %v91_v37  ;;  %168 = vmatprep.subr.mxu0 %v84_v38  ;;  %v45_v37 = vld [vmem:[#allocation2 + $0x20] sm:$0xff] }
  0x3e   :  { %238 = vmatprep.subr.mxu1 %v86_v39 }
  0x40   :  { %169 = vmatpush1.xpose.msra.mxu0 %v83_v40 }
  0x41   :  { %239 = vmatpush1.xpose.msra.mxu1 %v85_v41  ;;  %170 = vmatprep.subr.mxu0 %v78_v42  ;;  %v377_v42 = vld [vmem:[%s488_s2] ss:$0 sm:$0xff] }
  0x42   :  { %240 = vmatprep.subr.mxu1 %v80_v43 }
  0x44   :  { %171 = vmatpush1.xpose.msra.mxu0 %v77_v44 }
  0x45   :  { %241 = vmatpush1.xpose.msra.mxu1 %v79_v45  ;;  %172 = vmatprep.subr.mxu0 %v72_v46 }
  0x46   :  { %242 = vmatprep.subr.mxu1 %v74_v47 }
  0x48   :  { %173 = vmatpush1.xpose.msra.mxu0 %v71_v48 }
  0x49   :  { %243 = vmatpush1.xpose.msra.mxu1 %v73_v49  ;;  %174 = vmatprep.subr.mxu0 %v66_v50 }
  0x4a   :  { %244 = vmatprep.subr.mxu1 %v68_v51 }
  0x4c   :  { %175 = vmatpush1.xpose.msra.mxu0 %v65_v52 }
  0x4d   :  { %245 = vmatpush1.xpose.msra.mxu1 %v67_v53  ;;  %176 = vmatprep.subr.mxu0 %v60_v54 }
  0x4e   :  { %246 = vmatprep.subr.mxu1 %v62_v55 }
  0x50   :  { %177 = vmatpush1.xpose.msra.mxu0 %v59_v56 }
  0x51   :  { %247 = vmatpush1.xpose.msra.mxu1 %v61_v57  ;;  %178 = vmatprep.subr.mxu0 %v54_v58 }
  0x52   :  { %248 = vmatprep.subr.mxu1 %v56_v59 }
  0x54   :  { %179 = vmatpush1.xpose.msra.mxu0 %v53_v60 }
  0x55   :  { %249 = vmatpush1.xpose.msra.mxu1 %v55_v61  ;;  %180 = vmatprep.subr.mxu0 %v48_v62 }
  0x56   :  { %250 = vmatprep.subr.mxu1 %v50_v63 }
  0x58   :  { %181 = vmatpush1.xpose.msra.mxu0 %v47_v0 }
  0x59   :  { %251 = vmatpush1.xpose.msra.mxu1 %v49_v1  ;;  %290 = vmatprep.subr.mxu0 %v142_v2 }
  0x5b   :  { %215 = vmatmul.mubr.f32.vlgmr.msra.gmra.mxu0 %v41_v3 }
  0x5c   :  { %285 = vmatmul.mubr.f32.vlgmr.msra.gmra.mxu1 %v43_v4  ;;  %291 = vmatpush1.xpose.msra.mxu0 %v141_v5 }
  0x5d   :  { %354 = vmatprep.mubr.f32.mxu0 %v46_v6  ;;  %292 = vmatprep.subr.mxu0 %v136_v7 }
  0x60   :  { %293 = vmatpush1.xpose.msra.mxu0 %v135_v8 }
  0x61   :  { %294 = vmatprep.subr.mxu0 %v130_v9 }
  0x64   :  { %295 = vmatpush1.xpose.msra.mxu0 %v129_v10 }
  0x65   :  { %296 = vmatprep.subr.mxu0 %v124_v11 }
  0x68   :  { %297 = vmatpush1.xpose.msra.mxu0 %v123_v12 }
  0x69   :  { %298 = vmatprep.subr.mxu0 %v118_v13 }
  0x6c   :  { %299 = vmatpush1.xpose.msra.mxu0 %v117_v14 }
  0x6d   :  { %300 = vmatprep.subr.mxu0 %v112_v15 }
  0x70   :  { %301 = vmatpush1.xpose.msra.mxu0 %v111_v16 }
  0x71   :  { %302 = vmatprep.subr.mxu0 %v106_v17 }
  0x74   :  { %303 = vmatpush1.xpose.msra.mxu0 %v105_v18 }
  0x75   :  { %304 = vmatprep.subr.mxu0 %v100_v19 }
  0x78   :  { %305 = vmatpush1.xpose.msra.mxu0 %v99_v20 }
  0x79   :  { %306 = vmatprep.subr.mxu0 %v94_v21 }
  0x7c   :  { %307 = vmatpush1.xpose.msra.mxu0 %v93_v22 }
  0x7d   :  { %308 = vmatprep.subr.mxu0 %v88_v23 }
  0x80   :  { %309 = vmatpush1.xpose.msra.mxu0 %v87_v24 }
  0x81   :  { %310 = vmatprep.subr.mxu0 %v82_v25 }
  0x84   :  { %311 = vmatpush1.xpose.msra.mxu0 %v81_v26 }
  0x85   :  { %312 = vmatprep.subr.mxu0 %v76_v27 }
  0x88   :  { %313 = vmatpush1.xpose.msra.mxu0 %v75_v28 }
  0x89   :  { %314 = vmatprep.subr.mxu0 %v70_v29 }
  0x8c   :  { %315 = vmatpush1.xpose.msra.mxu0 %v69_v30 }
  0x8d   :  { %316 = vmatprep.subr.mxu0 %v64_v31 }
  0x90   :  { %317 = vmatpush1.xpose.msra.mxu0 %v63_v32 }
  0x91   :  { %318 = vmatprep.subr.mxu0 %v58_v33 }
  0x94   :  { %319 = vmatpush1.xpose.msra.mxu0 %v57_v34 }
  0x95   :  { %320 = vmatprep.subr.mxu0 %v52_v35 }
  0x98   :  { %321 = vmatpush1.xpose.msra.mxu0 %v51_v36 }
  0x9b   :  { %355 = vmatmul.mubr.f32.vlgmr.msra.gmra.mxu0 %v45_v37 }
 0x11b   :  { %v216_v38 = vpop.f32.mrf.mxu0 }
 0x11c   :  { %v286_v39 = vpop.f32.mrf.mxu1  ;;  %v217_v43 = vadd.f32 %v377_v42, %v216_v38 }
 0x11d   :  { %v218_v40 = vpop.f32.mrf.mxu0 }
 0x11e   :  { %v288_v41 = vpop.f32.mrf.mxu1  ;;  %v287_v44 = vadd.f32 %v286_v39, %v217_v43 }
 0x15b   :  { %v356_v45 = vpop.f32.mrf.mxu0 }
 0x15c   :  { %v357_v46 = vadd.f32 %v356_v45, %v287_v44 }
 0x15d   :  { %v358_v47 = vpop.f32.mrf.mxu0 }
 0x15e   :  { %360 = vst [vmem:[#allocation7] sm:$0xff] %v357_v46 }
 0x15f   :  { %434 = shalt.err (!%p431_p0)
}
 0x160   :  { %370 = dma.vmem_to_hbm [thread:$0]  %s368_s25, 128, %s489_s3, [#allocation4]  }
 0x161   :  { %447 = dma.done.wait [#allocation4], 128  }
 0x162   :  { %448 = vsyncadd [#allocation4], 4294967168 }
 0x163   :  { %374 = vsyncpa [#allocation3], 1 }
 0x164   :  { %375 = vsyncpa [#allocation6], 1 }
 0x165   :  { %376 = vsyncpa [#allocation4], 1 }

</bundles_post_ra>
